<compile_context>
chip_gen: v7x
topology: tpu7x:2x2x1
jax: 0.10.0
libtpu: 0.0.40
codegen_flags: <defaults>
</compile_context>

<pallas_src>
import numpy as np
import jax
import jax.numpy as jnp
from jax.experimental import pallas as pl
from jax.experimental.pallas import tpu as pltpu


def _rat_product_kernel(xg_ref, sel_ref, out_ref):
    # xg_ref : (TR, 2C)   flattened (batch*feature) rows, [left | right] per row
    # sel_ref: (2C, C*C)  constant 0/1 selector matrix
    # out_ref: (TR, C*C)  lane-dense output tile
    out_ref[...] = jnp.dot(
        xg_ref[...], sel_ref[...],
        precision=jax.lax.Precision.HIGHEST,     # 0/1 weights + HIGHEST -> exact sum
        preferred_element_type=jnp.float32,
    ).astype(out_ref.dtype)


def _cdiv(a, b):
    return -(-a // b)


def _round_up(x, m):
    return _cdiv(x, m) * m


def _choose_row_tile(rows, cc, itemsize, target_bytes=4 << 20, min_steps=8):
    """Row tile (multiple of 8) whose output tile is ~target_bytes.

    Keeps >= min_steps grid steps when rows allow it (>= 2 pipelined steps per
    v7x TensorCore); does not shrink the tile for small problems where the
    whole output fits in one or two tiles anyway.
    """
    tr = max(8, (target_bytes // max(cc * itemsize, 1)) // 8 * 8)
    if rows > min_steps * 8:
        tr = min(tr, _round_up(_cdiv(rows, min_steps), 8))
    tr = min(tr, _round_up(rows, 8))
    return max(tr, 8)


class RatProduct:
    """JAX/Pallas re-implementation of the layerwise RAT product node."""

    def __init__(self, in_features, seed=0):
        cardinality = 2
        self.in_features = int(in_features)
        self.cardinality = cardinality
        self._out_features = int(np.ceil(self.in_features / cardinality))
        # Deterministic scope permutation (replaces np.random.permutation at init).
        rng = np.random.RandomState(seed)
        scopes = rng.permutation(self.in_features)
        sc = [[] for _ in range(cardinality)]
        for i in range(0, self.in_features, cardinality):
            for j in range(cardinality):
                if i + j < self.in_features:
                    sc[j].append(int(scopes[i + j]))
                else:
                    sc[j].append(self.in_features)
        self._scopes = np.array(sc)             # (2, F)
        self._scopes_t = self._scopes.T.copy()  # (F, 2): [left, right] per feature
        self._sel_cache = {}
        self.out_shape = f'(N, {self._out_features}, C_in^2)'

    def _selector(self, C):
        sel = self._sel_cache.get(C)
        if sel is None:
            sel = np.zeros((2 * C, C * C), dtype=np.float32)
            cols = np.arange(C * C)
            sel[cols // C, cols] = 1.0        # left  contribution (c1)
            sel[C + (cols % C), cols] = 1.0   # right contribution (c2)
            self._sel_cache[C] = sel
        return sel

    def __call__(self, x):
        # TODO(synk): the PyTorch pad branch (in_features != x.shape[1]) and odd
        # in_features (scope value == in_features addressing a zero pad row) are
        # not implemented; the standard RAT-SPN configuration (even, matching
        # in_features) is assumed.
        assert x.shape[1] == self.in_features, "expected x.shape[1] == in_features"
        assert self.in_features % self.cardinality == 0, \
            "odd in_features (pad row) not supported"
        B, _, C = x.shape
        F = self._out_features
        CC = C * C
        itemsize = jnp.dtype(x.dtype).itemsize
        # TODO(synk): for tiny channel counts (C*C < 128) the output stores
        # become lane-masked; fold several features into the lane axis if such
        # configs are ever used.

        # Fused scope gather with transposed scopes -> (B, F, 2, C); flatten so
        # every output row is a dense [left | right] vector of width 2C.
        xg2d = x[:, self._scopes_t, :].reshape(B * F, 2 * C)
        rows = B * F

        TR = _choose_row_tile(rows, CC, itemsize)
        rows_pad = _round_up(rows, TR)
        if rows_pad != rows:
            xg2d = jnp.pad(xg2d, ((0, rows_pad - rows), (0, 0)))

        sel = jnp.asarray(self._selector(C), dtype=x.dtype)   # (2C, CC)

        grid = (rows_pad // TR,)
        out2d = pl.pallas_call(
            _rat_product_kernel,
            out_shape=jax.ShapeDtypeStruct((rows_pad, CC), x.dtype),
            grid=grid,
            in_specs=[
                pl.BlockSpec((TR, 2 * C), lambda r: (r, 0)),
                pl.BlockSpec((2 * C, CC), lambda r: (0, 0)),
            ],
            out_specs=pl.BlockSpec((TR, CC), lambda r: (r, 0)),
            compiler_params=pltpu.CompilerParams(
                dimension_semantics=("parallel",),
                vmem_limit_bytes=32 * 1024 * 1024,
            ),
        )(xg2d, sel)

        return out2d[:rows].reshape(B, F, CC)

    def __repr__(self):
        return 'RatProduct(in_features={}, out_shape={})'.format(
            self.in_features, self.out_shape)


if __name__ == "__main__":
    B, IN_FEATURES, C = 4, 8, 16

    key = jax.random.PRNGKey(0)
    x = jax.random.normal(key, (B, IN_FEATURES, C), dtype=jnp.float32)

    mod = RatProduct(IN_FEATURES, seed=0)
    out = jax.block_until_ready(mod(x))

    # Pure-JAX reference check of the forward semantics.
    F = mod._out_features
    left = x[:, mod._scopes[0, :], :]
    right = x[:, mod._scopes[1, :], :]
    ref = (left[:, :, :, None] + right[:, :, None, :]).reshape(B, F, C * C)

    assert out.shape == (B, F, C * C), out.shape
    np.testing.assert_allclose(np.asarray(out), np.asarray(ref),
                               rtol=1e-6, atol=1e-6)
    print("KERNEL_OK")
</pallas_src>

<mosaic_0001>
module attributes {stable_mosaic.version = 11 : i64} {
  func.func @_rat_product_kernel(%arg0: i32, %arg1: memref<16x32xf32, #tpu.memory_space<vmem>>, %arg2: memref<32x256xf32, #tpu.memory_space<vmem>>, %arg3: memref<16x256xf32, #tpu.memory_space<vmem>>) attributes {dimension_semantics = [#tpu.dimension_semantics<parallel>], iteration_bounds = array<i64: 1>, scalar_prefetch = 0 : i64, scratch_operands = 0 : i64, tpu.core_type = #tpu.core_type<tc>, window_params = [{transform_indices = @transform_0, window_bounds = array<i64: 16, 32>}, {pipeline_mode = #tpu.pipeline_mode<synchronous>, transform_indices = @transform_1, window_bounds = array<i64: 32, 256>}, {transform_indices = @transform_2, window_bounds = array<i64: 16, 256>}]} {
    %c0 = arith.constant 0 : index
    %c0_0 = arith.constant 0 : index
    %0 = vector.load %arg1[%c0, %c0_0] : memref<16x32xf32, #tpu.memory_space<vmem>>, vector<16x32xf32>
    %c0_1 = arith.constant 0 : index
    %c0_2 = arith.constant 0 : index
    %1 = vector.load %arg2[%c0_1, %c0_2] : memref<32x256xf32, #tpu.memory_space<vmem>>, vector<32x256xf32>
    %cst = arith.constant dense<0.000000e+00> : vector<16x256xf32>
    %2 = tpu.matmul %0, %1, %cst {dimension_numbers = #tpu.dot_dimension_numbers<[1], [0], [0], [1], [0, 0, 1, 1], [], []>, precision = #tpu.contract_precision<fp32>} : vector<16x32xf32>, vector<32x256xf32>, vector<16x256xf32> -> vector<16x256xf32>
    %c0_3 = arith.constant 0 : index
    %c0_4 = arith.constant 0 : index
    %3 = vector.load %arg3[%c0_3, %c0_4] : memref<16x256xf32, #tpu.memory_space<vmem>>, vector<16x256xf32>
    tpu.vector_store %arg3[%c0_3, %c0_4], %2 {strides = array<i32>} : memref<16x256xf32, #tpu.memory_space<vmem>>, vector<16x256xf32>,
    return
  }
  func.func @transform_0(%arg0: i32) -> (i32, i32) {
    %c0_i32 = arith.constant 0 : i32
    %c0_i32_0 = arith.constant 0 : i32
    return %arg0, %c0_i32 : i32, i32
  }
  func.func @transform_1(%arg0: i32) -> (i32, i32) {
    %c0_i32 = arith.constant 0 : i32
    %c0_i32_0 = arith.constant 0 : i32
    %c0_i32_1 = arith.constant 0 : i32
    return %c0_i32, %c0_i32_0 : i32, i32
  }
  func.func @transform_2(%arg0: i32) -> (i32, i32) {
    %c0_i32 = arith.constant 0 : i32
    %c0_i32_0 = arith.constant 0 : i32
    return %arg0, %c0_i32 : i32, i32
  }
}

</mosaic_0001>

<bundles_post_ra>
// kernel: tpu_custom_call.1
= control target key start
LH: loop header
LB: loop body
LE: loop exit
PB: predicated region body
PF: predicated region fallthrough
CT: control target
= control target key end

     0   :  { %7 = vsyncpa [#allocation3], 0  ;;  %s975_s0 = inlined_call_operand.hbm [shape: f32[16,32], index: 0, kind: input, shape index: {}]   ;;  %s976_s1 = inlined_call_operand.hbm [shape: f32[32,256], index: 1, kind: input, shape index: {}]   ;;  %s977_s2 = inlined_call_operand.hbm [shape: f32[16,256], index: 2, kind: output, shape index: {}]  }
   0x1   :  { %8 = vsyncpa [#allocation6], 0 }
   0x2   :  { %9 = vsyncpa [#allocation4], 0  ;;  %s819_s9 = smov [#allocation2]   ;;  %s747_s13 = scalar_lea.hbm %s975_s0, 256 }
   0x3   :  { %s15_s10 = sshll.u32 %s819_s9, 4  ;;  %p748_p0 = scmp.ne.s32.totalorder %s975_s0, %s747_s13  ;;  %s16_s10 = int_to_ptr.vmem [resolvable:$true] %s15_s10 }
   0x4   :  { %p751_p1 = scmp.lt.u32.totalorder %s747_s13, %s975_s0 }
   0x6   :  { %p753_p2 = pnand %p751_p1, %p748_p0 }
   0x8   :  { %756 = shalt.err (!%p753_p2)
}
   0x9   :  { %s757_s18 = scalar_lea.vmem %s16_s10, 256  ;;  %p762_p4 = scmp.lt.s32.totalorder %s16_s10, %s16_s10 }
   0xa   :  { %p758_p3 = scmp.ne.s32.totalorder %s16_s10, %s757_s18  ;;  %p763_p5 = scmp.lt.s32.totalorder %s757_s18, %s757_s18 }
   0xc   :  { %p764_p6 = por %p763_p5, %p762_p4 }
   0xe   :  { %p765_p7 = pnand %p764_p6, %p758_p3 }
  0x10   :  { %768 = shalt.err (!%p765_p7)
}
  0x11   :  { %s820_s19 = smov 128   ;;  %s821_s20 = smov 8  }
  0x12   :  { %21 = dma.hbm_to_vmem [thread:$0]  %s975_s0, 256, %s16_s10, [#allocation3], %s820_s19, %s820_s19, %s821_s20  }
  0x13   :  { %s822_s23 = smov [#allocation5]   ;;  %s769_s27 = scalar_lea.hbm %s976_s1, 1024 }
  0x14   :  { %s27_s24 = sshll.u32 %s822_s23, 4  ;;  %p770_p8 = scmp.ne.s32.totalorder %s976_s1, %s769_s27  ;;  %s28_s24 = int_to_ptr.vmem [resolvable:$true] %s27_s24 }
  0x15   :  { %p773_p9 = scmp.lt.u32.totalorder %s769_s27, %s976_s1 }
  0x17   :  { %p775_p10 = pnand %p773_p9, %p770_p8 }
  0x19   :  { %778 = shalt.err (!%p775_p10)
}
  0x1a   :  { %s779_s4 = scalar_lea.vmem %s28_s24, 1024  ;;  %p784_p12 = scmp.lt.s32.totalorder %s28_s24, %s28_s24 }
  0x1b   :  { %p780_p11 = scmp.ne.s32.totalorder %s28_s24, %s779_s4  ;;  %p785_p13 = scmp.lt.s32.totalorder %s779_s4, %s779_s4 }
  0x1d   :  { %p786_p0 = por %p785_p13, %p784_p12 }
  0x1f   :  { %p787_p1 = pnand %p786_p0, %p780_p11 }
  0x21   :  { %790 = shalt.err (!%p787_p1)
}
  0x22   :  { %s823_s0 = smov 256   ;;  %s824_s5 = smov 16  }
  0x23   :  { %33 = dma.hbm_to_vmem [thread:$0]  %s976_s1, 1024, %s28_s24, [#allocation6], %s823_s0, %s823_s0, %s824_s5  }
  0x24   :  { %813 = dma.done.wait [#allocation3], 256  }
  0x25   :  { %814 = vsyncadd [#allocation3], 4294967040 }
  0x26   :  { %815 = dma.done.wait [#allocation6], 1024  }
  0x27   :  { %816 = vsyncadd [#allocation6], 4294966272  ;;  %v825_v0 = vmov 0.0   ;;  %v43_v1 = vld [vmem:[#allocation5 + $0x8] sm:$0xff]  ;;  %v45_v2 = vld [vmem:[#allocation5 + $0x18] sm:$0xff]  ;;  %vm50_vm0 = vcmask 261120  }
  0x28   :  { %129 = vmatprep.mubr.f32.mxu1 %v825_v0  ;;  %440 = vmatprep.mubr.f32.mxu0 %v825_v0  ;;  %v42_v3 = vld [vmem:[#allocation5] sm:$0xff]  ;;  %v57_v4 = vand.u32 4294901760, %v43_v1  ;;  %v61_v5 = vand.u32 4294901760, %v45_v2  ;;  %v44_v6 = vld [vmem:[#allocation5 + $0x10] sm:$0xff]  ;;  %v47_v8 = vld [vmem:[#allocation5 + $0x28] sm:$0xff]  ;;  %s826_s1 = smov [#allocation7]  }
  0x29   :  { %v59_v7 = vand.u32 4294901760, %v42_v3  ;;  %v49_v9 = vld [vmem:[#allocation5 + $0x38] sm:$0xff]  ;;  %v63_v10 = vand.u32 4294901760, %v44_v6  ;;  %v65_v11 = vand.u32 4294901760, %v47_v8  ;;  %v46_v13 = vld [vmem:[#allocation5 + $0x20] sm:$0xff]  ;;  %v48_v14 = vld [vmem:[#allocation5 + $0x30] sm:$0xff] }
  0x2a   :  { %v69_v12 = vand.u32 4294901760, %v49_v9  ;;  %v40_v15 = vld [vmem:[#allocation2] sm:$0xff]  ;;  %v871_v16 = vpack.c.bf16 %v61_v5, %v57_v4  ;;  %v873_v17 = vsub.f32 %v43_v1, %v57_v4  ;;  %v875_v18 = vsub.f32 %v45_v2, %v61_v5  ;;  %v41_v32 = vld [vmem:[#allocation2 + $0x8] sm:$0xff]  ;;  %s658_s8 = sshll.u32 %s826_s1, 4  ;;  %s659_s8 = int_to_ptr.vmem [resolvable:$true] %s658_s8 }
  0x2b   :  { %v877_v19 = vsub.f32 %v42_v3, %v59_v7  ;;  %v879_v20 = vpack.c.bf16 %v63_v10, %v59_v7  ;;  %v881_v21 = vsub.f32 %v44_v6, %v63_v10  ;;  %v885_v23 = vsub.f32 %v47_v8, %v65_v11  ;;  %s791_s9 = scalar_lea.vmem %s659_s8, 512  ;;  %p796_p3 = scmp.lt.s32.totalorder %s659_s8, %s659_s8 }
  0x2c   :  { %v883_v22 = vpack.c.bf16 %v69_v12, %v65_v11  ;;  %672 = vmatprep.subr.bf16.mxu1 %v871_v16  ;;  %696 = vmatprep.subr.bf16.mxu0 %v871_v16  ;;  %v889_v24 = vsub.f32 %v49_v9, %v69_v12  ;;  %v67_v25 = vand.u32 4294901760, %v46_v13  ;;  %v71_v26 = vand.u32 4294901760, %v48_v14  ;;  %p792_p2 = scmp.ne.s32.totalorder %s659_s8, %s791_s9  ;;  %p797_p4 = scmp.lt.s32.totalorder %s791_s9, %s791_s9 }
  0x2d   :  { %v52_v27 = vsel %vm50_vm0, %v40_v15, 0  ;;  %674 = vmatpush1.bf16.msra.mxu1 %v879_v20  ;;  %698 = vmatpush1.bf16.msra.mxu0 %v879_v20  ;;  %v154_v29 = vand.u32 4294901760, %v873_v17  ;;  %v166_v30 = vand.u32 4294901760, %v875_v18  ;;  %v160_v31 = vand.u32 4294901760, %v877_v19 }
  0x2e   :  { %v894_v28 = vand.u32 4294901760, %v52_v27  ;;  %676 = vmatprep.subr.bf16.mxu1 %v883_v22  ;;  %700 = vmatprep.subr.bf16.mxu0 %v883_v22  ;;  %v901_v33 = vpack.c.bf16 %v71_v26, %v67_v25  ;;  %v903_v34 = vsub.f32 %v46_v13, %v67_v25  ;;  %v905_v35 = vsub.f32 %v48_v14, %v71_v26  ;;  %p798_p5 = por %p797_p4, %p796_p3 }
  0x2f   :  { %v172_v36 = vand.u32 4294901760, %v881_v21  ;;  %v155_v38 = vsub.f32 %v873_v17, %v154_v29  ;;  %v167_v39 = vsub.f32 %v875_v18, %v166_v30  ;;  %v703_v40 = vpack.c.bf16 %v166_v30, %v154_v29 }
  0x30   :  { %v909_v37 = vsub.f32 %v52_v27, %v894_v28  ;;  %v161_v41 = vsub.f32 %v877_v19, %v160_v31  ;;  %v55_v44 = vsel %vm50_vm0, %v41_v32, 0  ;;  %v178_v51 = vand.u32 4294901760, %v885_v23  ;;  %p799_p6 = pnand %p798_p5, %p792_p2 }
  0x31   :  { %v173_v42 = vsub.f32 %v881_v21, %v172_v36  ;;  %v705_v43 = vpack.c.bf16 %v172_v36, %v160_v31  ;;  %678 = vmatpush1.bf16.msra.mxu1 %v901_v33  ;;  %702 = vmatpush1.bf16.msra.mxu0 %v901_v33  ;;  %v156_v46 = vand.u32 4294901760, %v155_v38  ;;  %v168_v47 = vand.u32 4294901760, %v167_v39 }
  0x32   :  { %v132_v45 = vand.u32 4294901760, %v909_v37  ;;  %v919_v48 = vand.u32 4294901760, %v55_v44  ;;  %704 = vmatprep.subr.bf16.mxu0 %v703_v40  ;;  %v162_v49 = vand.u32 4294901760, %v161_v41  ;;  %v190_v52 = vand.u32 4294901760, %v889_v24 }
  0x33   :  { %v174_v50 = vand.u32 4294901760, %v173_v42  ;;  %v679_v54 = vpack.c.bf16 %v168_v47, %v156_v46  ;;  %v184_v56 = vand.u32 4294901760, %v903_v34  ;;  %v179_v58 = vsub.f32 %v885_v23, %v178_v51 }
  0x34   :  { %v133_v53 = vsub.f32 %v909_v37, %v132_v45  ;;  %v142_v55 = vsub.f32 %v55_v44, %v919_v48  ;;  %444 = vmatmul.mubr.f32.vlgmr.msra.gmra.mrb[0].mxu0 %v132_v45  ;;  %v191_v59 = vsub.f32 %v889_v24, %v190_v52  ;;  %v707_v60 = vpack.c.bf16 %v190_v52, %v178_v51 }
  0x35   :  { %v681_v57 = vpack.c.bf16 %v174_v50, %v162_v49  ;;  %680 = vmatprep.subr.bf16.mxu1 %v679_v54  ;;  %706 = vmatpush1.bf16.msra.mxu0 %v705_v43  ;;  %v185_v63 = vsub.f32 %v903_v34, %v184_v56  ;;  %v196_v1 = vand.u32 4294901760, %v905_v35  ;;  %v180_v2 = vand.u32 4294901760, %v179_v58 }
  0x36   :  { %v134_v61 = vand.u32 4294901760, %v133_v53  ;;  %v143_v62 = vand.u32 4294901760, %v142_v55  ;;  %449 = vmatprep.mubr.f32.mxu0 %v825_v0  ;;  %v192_v3 = vand.u32 4294901760, %v191_v59  ;;  %708 = vmatprep.subr.bf16.mxu0 %v707_v60  ;;  %v687_v11 = vpack.c.bf16 %v875_v18, %v873_v17 }
  0x37   :  { %v186_v5 = vand.u32 4294901760, %v185_v63  ;;  %v197_v6 = vsub.f32 %v905_v35, %v196_v1  ;;  %v709_v7 = vpack.c.bf16 %v196_v1, %v184_v56  ;;  %v689_v13 = vpack.c.bf16 %v881_v21, %v877_v19 }
  0x38   :  { %135 = vmatmul.mubr.f32.vlgmr.msra.gmra.mrb[0].mxu1 %v134_v61  ;;  %v144_v4 = vsub.f32 %v142_v55, %v143_v62  ;;  %v683_v8 = vpack.c.bf16 %v192_v3, %v180_v2  ;;  %453 = vmatmul.mubr.f32.gmra.mrb[2].mxu0 %v143_v62  ;;  %v691_v14 = vpack.c.bf16 %v889_v24, %v885_v23 }
  0x39   :  { %682 = vmatpush1.bf16.msra.mxu1 %v681_v57  ;;  %140 = vmatprep.mubr.f32.mxu1 %v825_v0  ;;  %v198_v10 = vand.u32 4294901760, %v197_v6  ;;  %v693_v15 = vpack.c.bf16 %v905_v35, %v903_v34 }
  0x3a   :  { %v145_v9 = vand.u32 4294901760, %v144_v4  ;;  %684 = vmatprep.subr.bf16.mxu1 %v683_v8  ;;  %710 = vmatpush1.bf16.msra.mxu0 %v709_v7 }
  0x3b   :  { %v685_v12 = vpack.c.bf16 %v198_v10, %v186_v5  ;;  %547 = vmatprep.mubr.f32.mxu0 %v825_v0  ;;  %712 = vmatprep.subr.bf16.mxu0 %v871_v16 }
  0x3c   :  { %146 = vmatmul.mubr.f32.gmra.mrb[2].mxu1 %v145_v9 }
  0x3d   :  { %256 = vmatprep.mubr.f32.mxu1 %v825_v0  ;;  %686 = vmatpush1.bf16.msra.mxu1 %v685_v12 }
  0x3e   :  { %549 = vmatmul.mubr.f32.vlgmr.msra.gmra.mrb[0].mxu0 %v894_v28  ;;  %688 = vmatprep.subr.bf16.mxu1 %v687_v11 }
  0x3f   :  { %714 = vmatpush1.bf16.msra.mxu0 %v879_v20  ;;  %554 = vmatprep.mubr.f32.mxu0 %v825_v0 }
  0x40   :  { %716 = vmatprep.subr.bf16.mxu0 %v883_v22  ;;  %258 = vmatmul.mubr.f32.vlgmr.msra.gmra.mrb[0].mxu1 %v894_v28 }
  0x41   :  { %690 = vmatpush1.bf16.msra.mxu1 %v689_v13  ;;  %263 = vmatprep.mubr.f32.mxu1 %v825_v0 }
  0x42   :  { %692 = vmatprep.subr.bf16.mxu1 %v691_v14  ;;  %556 = vmatmul.mubr.f32.gmra.mrb[2].mxu0 %v919_v48 }
  0x43   :  { %718 = vmatpush1.bf16.msra.mxu0 %v901_v33  ;;  %634 = vmatprep.mubr.f32.mxu0 %v825_v0 }
  0x44   :  { %265 = vmatmul.mubr.f32.gmra.mrb[2].mxu1 %v919_v48 }
  0x45   :  { %694 = vmatpush1.bf16.msra.mxu1 %v693_v15  ;;  %351 = vmatprep.mubr.f32.mxu1 %v825_v0 }
  0x46   :  { %636 = vmatmul.mubr.f32.vlgmr.msra.gmra.mrb[0].mxu0 %v894_v28 }
  0x47   :  { %641 = vmatprep.mubr.f32.mxu0 %v825_v0 }
  0x48   :  { %354 = vmatmul.mubr.f32.vlgmr.msra.gmra.mrb[0].mxu1 %v909_v37 }
  0x49   :  { %359 = vmatprep.mubr.f32.mxu1 %v825_v0 }
  0x4a   :  { %643 = vmatmul.mubr.f32.gmra.mrb[2].mxu0 %v919_v48 }
  0x4c   :  { %362 = vmatmul.mubr.f32.gmra.mrb[2].mxu1 %v142_v55 }
 0x119   :  { %v637_v16 = vpop.f32.mrb[0].mxu0 }
 0x11a   :  { %v639_v17 = vpop.f32.mrb[1].mxu0 }
 0x11b   :  { %v355_v18 = vpop.f32.mrb[0].mxu1 }
 0x11c   :  { %v719_v19 = vadd.f32 %v637_v16, %v355_v18  ;;  %v357_v20 = vpop.f32.mrb[1].mxu1 }
 0x11d   :  { %v720_v21 = vadd.f32 %v639_v17, %v357_v20  ;;  %v644_v22 = vpop.f32.mrb[2].mxu0 }
 0x11e   :  { %649 = vst [vmem:[#allocation7] sm:$0xff] %v719_v19  ;;  %v646_v23 = vpop.f32.mrb[3].mxu0 }
 0x11f   :  { %650 = vst [vmem:[#allocation7 + $0x8] sm:$0xff] %v720_v21  ;;  %v363_v24 = vpop.f32.mrb[2].mxu1 }
 0x120   :  { %v721_v25 = vadd.f32 %v644_v22, %v363_v24  ;;  %v365_v26 = vpop.f32.mrb[3].mxu1 }
 0x121   :  { %v722_v27 = vadd.f32 %v646_v23, %v365_v26 }
 0x122   :  { %651 = vst [vmem:[#allocation7 + $0x10] sm:$0xff] %v721_v25 }
 0x123   :  { %652 = vst [vmem:[#allocation7 + $0x18] sm:$0xff] %v722_v27 }
 0x124   :  { %802 = shalt.err (!%p799_p6)
}
 0x125   :  { %s803_s12 = scalar_lea.hbm %s977_s2, 512 }
 0x126   :  { %p804_p7 = scmp.ne.s32.totalorder %s977_s2, %s803_s12  ;;  %p807_p8 = scmp.lt.u32.totalorder %s803_s12, %s977_s2 }
 0x128   :  { %p809_p9 = pnand %p807_p8, %p804_p7 }
 0x12a   :  { %812 = shalt.err (!%p809_p9)
}
 0x12b   :  { %664 = dma.vmem_to_hbm [thread:$0]  %s659_s8, 512, %s977_s2, [#allocation4], %s823_s0, %s823_s0, %s824_s5  }
 0x12c   :  { %817 = dma.done.wait [#allocation4], 512  }
 0x12d   :  { %818 = vsyncadd [#allocation4], 4294966784 }
 0x12e   :  { %668 = vsyncpa [#allocation3], 1 }
 0x12f   :  { %669 = vsyncpa [#allocation6], 1 }
 0x130   :  { %670 = vsyncpa [#allocation4], 1 }

</bundles_post_ra>
